<compile_context>
chip_gen: v5e
topology: v5e:2x2
jax: 0.10.0
libtpu: 0.0.40
codegen_flags: <defaults>
</compile_context>

<pallas_src>
import functools

import jax
import jax.numpy as jnp
import numpy as np
from jax.experimental import pallas as pl
from jax.experimental.pallas import tpu as pltpu


def attn_kernel(x_ref, w1_ref, b1_ref, w2_ref, expand_ref, sp_ref, rp_ref, o_ref,
                *, unpadded_length):
    # x_ref:      [TL, A*D]   lane-dense data tile (neighbor-major along lanes)
    # w1_ref:     [A*D, A*H]  block-diagonal layer-1 weight  (kron(I_A, W1))
    # b1_ref:     [1, A*H]    layer-1 bias tiled per neighbor
    # w2_ref:     [A*H, A]    layer-2 weight grouped per neighbor (kron(I_A, w2))
    # expand_ref: [A, A*D]    kron(I_A, ones(1,D))  -- broadcast p over each neighbor's D lanes
    # sp_ref:     [A, A+D]    [I_A | 0]             -- place scores in lanes 0:A of the merged tile
    # rp_ref:     [A*D, A+D]  [0 | kron(1_A, I_D)]  -- sum over neighbors AND place in lanes A:A+D
    TL = o_ref.shape[0]
    row0 = pl.program_id(0) * TL

    @pl.when(row0 < unpadded_length)
    def _compute():
        x = x_ref[...]                                                      # [TL, A*D] f32

        # ---- MLP scoring head: Linear -> ReLU -> Linear, fully 2-D on the MXU ----
        h = jnp.dot(x, w1_ref[...], preferred_element_type=jnp.float32) + b1_ref[...]
        h = jnp.maximum(h, 0.0)                                             # ReLU   [TL, A*H]
        s = jnp.dot(h, w2_ref[...], preferred_element_type=jnp.float32)     # logits [TL, A]
        # (layer-2 bias omitted: a constant shift cancels in the softmax below)

        # ---- softmax over the neighbor axis (lanes, width A) ----
        s = s - jnp.max(s, axis=-1, keepdims=True)
        e = jnp.exp(s)
        denom = jnp.sum(e, axis=-1, keepdims=True)
        inv = pl.reciprocal(denom, approx=True)        # EUP slot (otherwise idle after exp)
        inv = inv * (2.0 - denom * inv)                # one Newton step -> ~f32-exact
        p = e * inv                                    # [TL, A]

        # ---- neighbor-weighted reduction + output merge, all on the (idle) MXU ----
        p_exp = jnp.dot(p, expand_ref[...], preferred_element_type=jnp.float32)   # [TL, A*D]
        merged = (jnp.dot(p, sp_ref[...], preferred_element_type=jnp.float32)
                  + jnp.dot(x * p_exp, rp_ref[...],
                            preferred_element_type=jnp.float32))                  # [TL, A+D]

        # ---- padding folded into the kernel: zero every row >= unpadded_length ----
        row = row0 + jax.lax.broadcasted_iota(jnp.int32, (TL, 1), 0)
        o_ref[...] = jnp.where(row < unpadded_length, merged, 0.0).astype(o_ref.dtype)

    @pl.when(row0 >= unpadded_length)
    def _zero_pad_tile():
        # Padding-only grid step: skip all compute, just write zeros.
        o_ref[...] = jnp.zeros_like(o_ref)


def pack_params(params, num_neighbors):
    """One-time re-packing so the per-neighbor MLP + weighted sum become dense 2-D matmuls.

    Call once at parameter-load time (outside the jitted forward) and reuse.
    """
    W1, b1, W2, b2 = params
    del b2  # constant shift before the softmax -> mathematically a no-op for both outputs
    D, H = W1.shape
    A = num_neighbors
    eye_a = jnp.eye(A, dtype=jnp.float32)

    w1_bd = jnp.kron(eye_a, W1.astype(jnp.float32))                     # [A*D, A*H]
    b1_t = jnp.tile(b1.reshape(1, H).astype(jnp.float32), (1, A))       # [1, A*H]
    w2_g = jnp.kron(eye_a, W2.reshape(H, 1).astype(jnp.float32))        # [A*H, A]
    expand = jnp.kron(eye_a, jnp.ones((1, D), jnp.float32))             # [A, A*D]
    score_place = jnp.concatenate(                                      # [A, A+D] = [I_A | 0]
        [eye_a, jnp.zeros((A, D), jnp.float32)], axis=1)
    reduce_place = jnp.concatenate(                                     # [A*D, A+D] = [0 | kron(1_A, I_D)]
        [jnp.zeros((A * D, A), jnp.float32),
         jnp.kron(jnp.ones((A, 1), jnp.float32), jnp.eye(D, dtype=jnp.float32))], axis=1)
    return w1_bd, b1_t, w2_g, expand, score_place, reduce_place


@functools.partial(jax.jit, static_argnames=("unpadded_length", "padded_length", "block_l"))
def multi_attention_forward(data, packed, *, unpadded_length, padded_length, block_l=None):
    """data: [N, A, D] float32; packed: output of pack_params.

    Returns (scores_pad [1,P,A,1], data_pad [1,P,D])."""
    w1_bd, b1_t, w2_g, expand, score_place, reduce_place = packed
    _, A, D = data.shape
    AH = w1_bd.shape[1]
    L = int(unpadded_length)
    P = int(padded_length)

    if L == 0:  # degenerate: everything is padding
        return (jnp.zeros((1, P, A, 1), jnp.float32), jnp.zeros((1, P, D), jnp.float32))

    # Lane-dense flat view of the valid rows: [L, A*D] (contiguous reshape, free in HBM).
    x = data[:L].reshape(L, A * D).astype(jnp.float32)

    # Tile choice: large tiles (cap 2048 rows) to amortize the ~0.35us/step overhead, but
    # sized so the *padded* range splits into >=2 parallel grid steps when possible, so
    # v7x's two TensorCores both get work (v5e/v6e have one TC and simply enjoy the big tile).
    # VMEM is not the constraint: even at 2048 rows the x tile is ~1 MiB (double-buffered
    # ~2 MiB), far under the scoped-VMEM default on every generation.
    if block_l is None:
        block_l = min(2048, max(8, 8 * pl.cdiv(pl.cdiv(P, 2), 8)))
    assert block_l % 8 == 0, "block_l must be sublane-aligned (multiple of 8)"

    grid = pl.cdiv(P, block_l)                  # grid covers the *padded* row range
    n_in_blocks = max(pl.cdiv(L, block_l), 1)   # clamp target for padding-only tiles

    kernel = functools.partial(attn_kernel, unpadded_length=L)

    merged = pl.pallas_call(
        kernel,
        # Single merged, lane-contiguous output: scores in lanes 0:A, reduced data in A:A+D.
        out_shape=jax.ShapeDtypeStruct((P, A + D), jnp.float32),
        grid_spec=pltpu.PrefetchScalarGridSpec(
            num_scalar_prefetch=0,
            grid=(grid,),
            in_specs=[
                # Data tile; padding-only grid steps re-point at the last valid block so the
                # DMA stays in-bounds (their compute is skipped by the pl.when gate anyway,
                # and the unchanged block index means the pipeline skips the re-fetch).
                pl.BlockSpec((block_l, A * D),
                             lambda i: (jnp.minimum(i, n_in_blocks - 1), 0)),
                pl.BlockSpec((A * D, AH), lambda i: (0, 0)),      # W1 (block-diagonal)
                pl.BlockSpec((1, AH), lambda i: (0, 0)),          # b1 (tiled per neighbor)
                pl.BlockSpec((AH, A), lambda i: (0, 0)),          # W2 (grouped)
                pl.BlockSpec((A, A * D), lambda i: (0, 0)),       # expand  kron(I_A, 1_D)
                pl.BlockSpec((A, A + D), lambda i: (0, 0)),       # score placement [I_A | 0]
                pl.BlockSpec((A * D, A + D), lambda i: (0, 0)),   # reduce+place [0 | kron(1_A, I_D)]
            ],
            out_specs=pl.BlockSpec((block_l, A + D), lambda i: (i, 0)),
        ),
        compiler_params=pltpu.CompilerParams(dimension_semantics=("parallel",)),
    )(x, w1_bd, b1_t, w2_g, expand, score_place, reduce_place)

    # Pure metadata slices/reshapes back to the PyTorch ranks (batch dim from .view(-1, ...)).
    scores_pad = merged[:, :A].reshape(1, P, A, 1)
    data_pad = merged[:, A:].reshape(1, P, D)
    return scores_pad, data_pad


def ref_forward(data, params, *, unpadded_length, padded_length):
    """Pure-JAX reference mirroring the PyTorch module (keeps b2 to confirm it cancels)."""
    W1, b1, W2, b2 = params
    x = data[:unpadded_length]
    L, A, D = x.shape
    x = x.reshape(1, L, A, D)
    h = jnp.maximum(x @ W1 + b1.reshape(-1), 0.0)
    s = h @ W2.reshape(-1, 1) + b2[0, 0]               # [1, L, A, 1]
    s = jax.nn.softmax(s, axis=-2)
    red = jnp.sum(x * s, axis=-2)                      # [1, L, D]
    scores_pad = jnp.zeros((1, padded_length, A, 1), s.dtype).at[:, :L].set(s)
    data_pad = jnp.zeros((1, padded_length, D), red.dtype).at[:, :L].set(red)
    return scores_pad, data_pad


if __name__ == "__main__":
    # Module config: units=[D, H, 1], activations=['relu', 'none']
    N, A, D, H = 20, 4, 32, 16
    unpadded_length = 16
    padded_length = 24

    key = jax.random.PRNGKey(0)
    k_data, k_w1, k_b1, k_w2, k_b2 = jax.random.split(key, 5)
    data = jax.random.normal(k_data, (N, A, D), dtype=jnp.float32)

    # Deterministic parameter init (Linear(D->H), Linear(H->1)); stored as [in, out].
    W1 = jax.random.normal(k_w1, (D, H), dtype=jnp.float32) * 0.1
    b1 = jax.random.normal(k_b1, (1, H), dtype=jnp.float32) * 0.1
    W2 = jax.random.normal(k_w2, (1, H), dtype=jnp.float32) * 0.1   # layer-2 weight (out_dim=1) as a row
    b2 = jax.random.normal(k_b2, (1, 1), dtype=jnp.float32) * 0.1   # cancels in the softmax; not sent to kernel
    params = (W1, b1, W2, b2)

    # Pack once at parameter-load time (not inside the jitted forward).
    packed = jax.tree.map(jax.block_until_ready, pack_params(params, A))

    scores_pad, data_pad = multi_attention_forward(
        data, packed, unpadded_length=unpadded_length, padded_length=padded_length)
    jax.block_until_ready((scores_pad, data_pad))

    ref_scores, ref_data = ref_forward(
        data, params, unpadded_length=unpadded_length, padded_length=padded_length)
    np.testing.assert_allclose(np.asarray(scores_pad), np.asarray(ref_scores), rtol=1e-5, atol=1e-5)
    np.testing.assert_allclose(np.asarray(data_pad), np.asarray(ref_data), rtol=1e-5, atol=1e-5)

    print("KERNEL_OK")
</pallas_src>

<mosaic_0001>
module attributes {stable_mosaic.version = 11 : i64} {
  func.func @attn_kernel(%arg0: i32, %arg1: memref<16x128xf32, #tpu.memory_space<vmem>>, %arg2: memref<128x64xf32, #tpu.memory_space<vmem>>, %arg3: memref<1x64xf32, #tpu.memory_space<vmem>>, %arg4: memref<64x4xf32, #tpu.memory_space<vmem>>, %arg5: memref<4x128xf32, #tpu.memory_space<vmem>>, %arg6: memref<4x36xf32, #tpu.memory_space<vmem>>, %arg7: memref<128x36xf32, #tpu.memory_space<vmem>>, %arg8: memref<16x36xf32, #tpu.memory_space<vmem>>) attributes {dimension_semantics = [#tpu.dimension_semantics<parallel>], iteration_bounds = array<i64: 2>, scalar_prefetch = 0 : i64, scratch_operands = 0 : i64, tpu.core_type = #tpu.core_type<tc>, window_params = [{transform_indices = @transform_0, window_bounds = array<i64: 16, 128>}, {pipeline_mode = #tpu.pipeline_mode<synchronous>, transform_indices = @transform_1, window_bounds = array<i64: 128, 64>}, {pipeline_mode = #tpu.pipeline_mode<synchronous>, transform_indices = @transform_2, window_bounds = array<i64: 1, 64>}, {pipeline_mode = #tpu.pipeline_mode<synchronous>, transform_indices = @transform_3, window_bounds = array<i64: 64, 4>}, {pipeline_mode = #tpu.pipeline_mode<synchronous>, transform_indices = @transform_4, window_bounds = array<i64: 4, 128>}, {pipeline_mode = #tpu.pipeline_mode<synchronous>, transform_indices = @transform_5, window_bounds = array<i64: 4, 36>}, {pipeline_mode = #tpu.pipeline_mode<synchronous>, transform_indices = @transform_6, window_bounds = array<i64: 128, 36>}, {transform_indices = @transform_7, window_bounds = array<i64: 16, 36>}]} {
    %c16_i32 = arith.constant 16 : i32
    %0 = arith.muli %arg0, %c16_i32 : i32
    %c16_i32_0 = arith.constant 16 : i32
    %1 = arith.cmpi slt, %0, %c16_i32_0 : i32
    %2 = arith.extui %1 : i1 to i32
    %c0_i32 = arith.constant 0 : i32
    %3 = arith.cmpi ne, %2, %c0_i32 : i32
    scf.if %3 {
      %c0 = arith.constant 0 : index
      %c0_3 = arith.constant 0 : index
      %7 = vector.load %arg1[%c0, %c0_3] : memref<16x128xf32, #tpu.memory_space<vmem>>, vector<16x128xf32>
      %c0_4 = arith.constant 0 : index
      %c0_5 = arith.constant 0 : index
      %8 = vector.load %arg2[%c0_4, %c0_5] : memref<128x64xf32, #tpu.memory_space<vmem>>, vector<128x64xf32>
      %cst = arith.constant dense<0.000000e+00> : vector<16x64xf32>
      %9 = tpu.matmul %7, %8, %cst {dimension_numbers = #tpu.dot_dimension_numbers<[1], [0], [0], [1], [0, 0, 1, 1], [], []>} : vector<16x128xf32>, vector<128x64xf32>, vector<16x64xf32> -> vector<16x64xf32>
      %c0_6 = arith.constant 0 : index
      %c0_7 = arith.constant 0 : index
      %10 = vector.load %arg3[%c0_6, %c0_7] : memref<1x64xf32, #tpu.memory_space<vmem>>, vector<1x64xf32>
      %11 = vector.broadcast %10 : vector<1x64xf32> to vector<16x64xf32>
      %12 = arith.addf %9, %11 : vector<16x64xf32>
      %cst_8 = arith.constant 0.000000e+00 : f32
      %13 = vector.broadcast %cst_8 : f32 to vector<16x64xf32>
      %14 = arith.maximumf %12, %13 : vector<16x64xf32>
      %c0_9 = arith.constant 0 : index
      %c0_10 = arith.constant 0 : index
      %15 = vector.load %arg4[%c0_9, %c0_10] : memref<64x4xf32, #tpu.memory_space<vmem>>, vector<64x4xf32>
      %cst_11 = arith.constant dense<0.000000e+00> : vector<16x4xf32>
      %16 = tpu.matmul %14, %15, %cst_11 {dimension_numbers = #tpu.dot_dimension_numbers<[1], [0], [0], [1], [0, 0, 1, 1], [], []>} : vector<16x64xf32>, vector<64x4xf32>, vector<16x4xf32> -> vector<16x4xf32>
      %cst_12 = arith.constant dense<0xFF800000> : vector<16xf32>
      %17 = vector.multi_reduction <maximumf>, %16, %cst_12 [1] : vector<16x4xf32> to vector<16xf32>
      %18 = vector.shape_cast %17 : vector<16xf32> to vector<16x1xf32>
      %19 = vector.broadcast %18 : vector<16x1xf32> to vector<16x4xf32>
      %20 = arith.subf %16, %19 : vector<16x4xf32>
      %21 = math.exp %20 : vector<16x4xf32>
      %cst_13 = arith.constant dense<0.000000e+00> : vector<16xf32>
      %22 = vector.multi_reduction <add>, %21, %cst_13 [1] : vector<16x4xf32> to vector<16xf32>
      %23 = vector.shape_cast %22 : vector<16xf32> to vector<16x1xf32>
      %24 = tpu.reciprocal %23 {approx = true} : vector<16x1xf32> -> vector<16x1xf32>
      %25 = arith.mulf %23, %24 : vector<16x1xf32>
      %cst_14 = arith.constant 2.000000e+00 : f32
      %26 = vector.broadcast %cst_14 : f32 to vector<16x1xf32>
      %27 = arith.subf %26, %25 : vector<16x1xf32>
      %28 = arith.mulf %24, %27 : vector<16x1xf32>
      %29 = vector.broadcast %28 : vector<16x1xf32> to vector<16x4xf32>
      %30 = arith.mulf %21, %29 : vector<16x4xf32>
      %c0_15 = arith.constant 0 : index
      %c0_16 = arith.constant 0 : index
      %31 = vector.load %arg5[%c0_15, %c0_16] : memref<4x128xf32, #tpu.memory_space<vmem>>, vector<4x128xf32>
      %cst_17 = arith.constant dense<0.000000e+00> : vector<16x128xf32>
      %32 = tpu.matmul %30, %31, %cst_17 {dimension_numbers = #tpu.dot_dimension_numbers<[1], [0], [0], [1], [0, 0, 1, 1], [], []>} : vector<16x4xf32>, vector<4x128xf32>, vector<16x128xf32> -> vector<16x128xf32>
      %c0_18 = arith.constant 0 : index
      %c0_19 = arith.constant 0 : index
      %33 = vector.load %arg6[%c0_18, %c0_19] : memref<4x36xf32, #tpu.memory_space<vmem>>, vector<4x36xf32>
      %cst_20 = arith.constant dense<0.000000e+00> : vector<16x36xf32>
      %34 = tpu.matmul %30, %33, %cst_20 {dimension_numbers = #tpu.dot_dimension_numbers<[1], [0], [0], [1], [0, 0, 1, 1], [], []>} : vector<16x4xf32>, vector<4x36xf32>, vector<16x36xf32> -> vector<16x36xf32>
      %35 = arith.mulf %7, %32 : vector<16x128xf32>
      %c0_21 = arith.constant 0 : index
      %c0_22 = arith.constant 0 : index
      %36 = vector.load %arg7[%c0_21, %c0_22] : memref<128x36xf32, #tpu.memory_space<vmem>>, vector<128x36xf32>
      %cst_23 = arith.constant dense<0.000000e+00> : vector<16x36xf32>
      %37 = tpu.matmul %35, %36, %cst_23 {dimension_numbers = #tpu.dot_dimension_numbers<[1], [0], [0], [1], [0, 0, 1, 1], [], []>} : vector<16x128xf32>, vector<128x36xf32>, vector<16x36xf32> -> vector<16x36xf32>
      %38 = arith.addf %34, %37 : vector<16x36xf32>
      %39 = tpu.iota {dimensions = array<i32: 0>} : vector<16x1xi32>
      %40 = vector.broadcast %0 : i32 to vector<16x1xi32>
      %41 = arith.addi %40, %39 : vector<16x1xi32>
      %c16_i32_24 = arith.constant 16 : i32
      %42 = vector.broadcast %c16_i32_24 : i32 to vector<16x1xi32>
      %43 = arith.cmpi slt, %41, %42 : vector<16x1xi32>
      %cst_25 = arith.constant 0.000000e+00 : f32
      %44 = vector.shape_cast %43 : vector<16x1xi1> to vector<16x1xi1>
      %45 = vector.broadcast %44 : vector<16x1xi1> to vector<16x36xi1>
      %46 = vector.broadcast %cst_25 : f32 to vector<16x36xf32>
      %47 = arith.select %45, %38, %46 : vector<16x36xi1>, vector<16x36xf32>
      %c0_26 = arith.constant 0 : index
      %c0_27 = arith.constant 0 : index
      %48 = vector.load %arg8[%c0_26, %c0_27] : memref<16x36xf32, #tpu.memory_space<vmem>>, vector<16x36xf32>
      tpu.vector_store %arg8[%c0_26, %c0_27], %47 {strides = array<i32>} : memref<16x36xf32, #tpu.memory_space<vmem>>, vector<16x36xf32>,
    } else {
    }
    %c16_i32_1 = arith.constant 16 : i32
    %4 = arith.cmpi sge, %0, %c16_i32_1 : i32
    %5 = arith.extui %4 : i1 to i32
    %c0_i32_2 = arith.constant 0 : i32
    %6 = arith.cmpi ne, %5, %c0_i32_2 : i32
    scf.if %6 {
      %cst = arith.constant 0.000000e+00 : f32
      %7 = vector.broadcast %cst : f32 to vector<16x36xf32>
      %c0 = arith.constant 0 : index
      %c0_3 = arith.constant 0 : index
      %8 = vector.load %arg8[%c0, %c0_3] : memref<16x36xf32, #tpu.memory_space<vmem>>, vector<16x36xf32>
      tpu.vector_store %arg8[%c0, %c0_3], %7 {strides = array<i32>} : memref<16x36xf32, #tpu.memory_space<vmem>>, vector<16x36xf32>,
    } else {
    }
    return
  }
  func.func @transform_0(%arg0: i32) -> (i32, i32) {
    %c0_i32 = arith.constant 0 : i32
    %0 = arith.minsi %arg0, %c0_i32 : i32
    %c0_i32_0 = arith.constant 0 : i32
    %c0_i32_1 = arith.constant 0 : i32
    return %0, %c0_i32_0 : i32, i32
  }
  func.func @transform_1(%arg0: i32) -> (i32, i32) {
    %c0_i32 = arith.constant 0 : i32
    %c0_i32_0 = arith.constant 0 : i32
    %c0_i32_1 = arith.constant 0 : i32
    return %c0_i32, %c0_i32_0 : i32, i32
  }
  func.func @transform_2(%arg0: i32) -> (i32, i32) {
    %c0_i32 = arith.constant 0 : i32
    %c0_i32_0 = arith.constant 0 : i32
    %c0_i32_1 = arith.constant 0 : i32
    return %c0_i32, %c0_i32_0 : i32, i32
  }
  func.func @transform_3(%arg0: i32) -> (i32, i32) {
    %c0_i32 = arith.constant 0 : i32
    %c0_i32_0 = arith.constant 0 : i32
    %c0_i32_1 = arith.constant 0 : i32
    return %c0_i32, %c0_i32_0 : i32, i32
  }
  func.func @transform_4(%arg0: i32) -> (i32, i32) {
    %c0_i32 = arith.constant 0 : i32
    %c0_i32_0 = arith.constant 0 : i32
    %c0_i32_1 = arith.constant 0 : i32
    return %c0_i32, %c0_i32_0 : i32, i32
  }
  func.func @transform_5(%arg0: i32) -> (i32, i32) {
    %c0_i32 = arith.constant 0 : i32
    %c0_i32_0 = arith.constant 0 : i32
    %c0_i32_1 = arith.constant 0 : i32
    return %c0_i32, %c0_i32_0 : i32, i32
  }
  func.func @transform_6(%arg0: i32) -> (i32, i32) {
    %c0_i32 = arith.constant 0 : i32
    %c0_i32_0 = arith.constant 0 : i32
    %c0_i32_1 = arith.constant 0 : i32
    return %c0_i32, %c0_i32_0 : i32, i32
  }
  func.func @transform_7(%arg0: i32) -> (i32, i32) {
    %c0_i32 = arith.constant 0 : i32
    %c0_i32_0 = arith.constant 0 : i32
    return %arg0, %c0_i32 : i32, i32
  }
}

</mosaic_0001>

<bundles_post_ra>
// kernel: multi_attention_forward.1
= control target key start
LH: loop header
LB: loop body
LE: loop exit
PB: predicated region body
PF: predicated region fallthrough
CT: control target
= control target key end

     0   :  { %s1024_s24 = smov 0   ;;  %s1026_s25 = smov 0   ;;  %s1257_s0 = inlined_call_operand.vmem [shape: f32[16,128], index: 0, kind: input, shape index: {}]   ;;  %s1258_s1 = inlined_call_operand.vmem [shape: f32[128,64], index: 1, kind: input, shape index: {}]   ;;  %s1259_s2 = inlined_call_operand.vmem [shape: f32[1,64], index: 2, kind: input, shape index: {}]   ;;  %s1260_s3 = inlined_call_operand.vmem [shape: f32[64,4], index: 3, kind: input, shape index: {}]   ;;  %s1261_s4 = inlined_call_operand.vmem [shape: f32[4,128], index: 4, kind: input, shape index: {}]   ;;  %s1262_s5 = inlined_call_operand.vmem [shape: f32[4,36], index: 5, kind: input, shape index: {}]   ;;  %s1263_s6 = inlined_call_operand.vmem [shape: f32[128,36], index: 6, kind: input, shape index: {}]   ;;  %s1264_s7 = inlined_call_operand.vmem [shape: f32[24,36], index: 7, kind: output, shape index: {}]  }
   0x1   :  { %s1028_s26 = smov 0  }
   0x2 LB: > { %s1035_s27 = sadd.s32 4294967295, %s949_s26   ;;  %s1037_s28 = sadd.s32 1, %s949_s26   ;;  %s949_s26 = sphi %s1028_s26, %s1268_s26   ;;  %s945_s25 = sphi %s1026_s25, %s1267_s25   ;;  %s941_s24 = sphi %s1024_s24, %s1266_s24  }
   0x3   : > { %s177_s29 = ssub.s32 %s949_s26, %s1037_s28  ;;  %s180_s30 = sadd.s32 1, %s945_s25 }
   0x4   : > { %p178_p0 = scmp.eq.s32.totalorder %s177_s29, 0  ;;  %p190_p1 = scmp.ne.s32.totalorder %s945_s25, %s941_s24 }
   0x5   : > { %p191_p2 = scmp.eq.s32.totalorder %s1035_s27, 1  ;;  %p762_p3 = scmp.ge.s32.totalorder %s949_s26, 1 }
   0x6   : > { %s1044_s8 = scalar_select %p178_p0, %s945_s25, %s180_s30  }
   0x7   : > { %p1046_p4 = por %p191_p2, %p190_p1  ;;  %p246_p5 = scmp.lt.s32.totalorder %s949_s26, 3 }
   0x9   : > { %p247_p6 = pnand %p762_p3, %p246_p5 }
   0xa   : > { %s276_s10 = sand.u32 (!%p247_p6), 1, %s941_s24   ;;  %p279_p7 = scmp.lt.s32.totalorder (!%p247_p6), %s1035_s27, 0 }
   0xb   : > { %250 = sbr.rel (%p247_p6) target bundleno = 904 (0x388), region = 48  ;;  %s763_s11 = sshll.u32 (!%p247_p6), %s276_s10, 4 }
   0xc   : > { %s1052_s12 = sshll.u32 (!%p247_p6), %s1035_s27, 4  ;;  %s1060_s19 = scalar_lea.vmem (!%p247_p6), [#allocation2], %s763_s11  }
   0xd   : > { %p767_p9 = scmp.ge.s32.totalorder (!%p247_p6), %s1052_s12, 16 }
  0x10   : > { %s280_s13 = scalar_select %p279_p7, %s1035_s27, 0 }
  0x12   : > { %s764_s14 = sshll.u32 %s280_s13, 1 }
  0x13   : > { %p282_p8 = scmp.lt.s32.totalorder %s764_s14, 1  ;;  %298 = sbr.rel (%p767_p9) target bundleno = 850 (0x352), region = 52 }
  0x15   : > { %s1270_s14 = smov (!%p282_p8, %s764_s14), 1 }
  0x16   : > { %s765_s15 = sshll.u32 %s1270_s14, 3 }
  0x17   : > { %s1058_s18 = scalar_lea.vmem %s1257_s0, %s765_s15 }
  0x18   : > { %v316_v0 = vld [vmem:[%s1258_s1 + $0x78] sm:$0xff]  ;;  %v315_v1 = vld [vmem:[%s1258_s1 + $0x70] sm:$0xff]  ;;  %v314_v2 = vld [vmem:[%s1258_s1 + $0x68] sm:$0xff]  ;;  %vm354_vm0 = vcmask 523264   ;;  %vm384_vm1 = vcmask 31744   ;;  %vm420_vm2 = vcmask 1043456  }
  0x19   : > { %321 = vmatpush.msra.mxu0 %v316_v0  ;;  %v313_v3 = vld [vmem:[%s1258_s1 + $0x60] sm:$0xff]  ;;  %v312_v4 = vld [vmem:[%s1258_s1 + $0x58] sm:$0xff]  ;;  %v311_v5 = vld [vmem:[%s1258_s1 + $0x50] sm:$0xff]  ;;  %vm529_vm4 = vcmask 293888  }
  0x1a   : > { %v353_v6 = vld [vmem:[%s1260_s3 + $0x38] sm:$0xff]  ;;  %v352_v7 = vld [vmem:[%s1260_s3 + $0x30] sm:$0xff]  ;;  %v310_v8 = vld [vmem:[%s1258_s1 + $0x48] sm:$0xff] }
  0x1b   : > { %322 = vmatpush.msra.mxu0 %v315_v1  ;;  %369 = vmatpush.msra.mxu1 %v353_v6  ;;  %v351_v9 = vld [vmem:[%s1260_s3 + $0x28] sm:$0xff]  ;;  %v309_v10 = vld [vmem:[%s1258_s1 + $0x40] sm:$0xff]  ;;  %v308_v12 = vld [vmem:[%s1258_s1 + $0x38] sm:$0xff] }
  0x1c   : > { %v350_v11 = vld [vmem:[%s1260_s3 + $0x20] sm:$0xff]  ;;  %v349_v13 = vld [vmem:[%s1260_s3 + $0x18] sm:$0xff]  ;;  %v307_v14 = vld [vmem:[%s1258_s1 + $0x30] sm:$0xff] }
  0x1d   : > { %323 = vmatpush.msra.mxu0 %v314_v2  ;;  %370 = vmatpush.msra.mxu1 %v352_v7  ;;  %v306_v15 = vld [vmem:[%s1258_s1 + $0x28] sm:$0xff]  ;;  %v305_v16 = vld [vmem:[%s1258_s1 + $0x20] sm:$0xff]  ;;  %v304_v17 = vld [vmem:[%s1258_s1 + $0x18] sm:$0xff] }
  0x1e   : > { %v303_v18 = vld [vmem:[%s1258_s1 + $0x10] sm:$0xff]  ;;  %v302_v19 = vld [vmem:[%s1258_s1 + $0x8] sm:$0xff]  ;;  %v301_v20 = vld [vmem:[%s1258_s1] sm:$0xff] }
  0x1f   : > { %324 = vmatpush.msra.mxu0 %v313_v3  ;;  %371 = vmatpush.msra.mxu1 %v351_v9  ;;  %v1127_v21 = vld [vmem:[%s1058_s18] sm:$0xff]  ;;  %v1131_v22 = vld [vmem:[%s1058_s18 + $0x8] sm:$0xff]  ;;  %v348_v23 = vld [vmem:[%s1260_s3 + $0x10] sm:$0xff] }
  0x20   : > { %v347_v24 = vld [vmem:[%s1260_s3 + $0x8] sm:$0xff]  ;;  %v346_v25 = vld [vmem:[%s1260_s3] sm:$0xff]  ;;  %v465_v53 = vld [vmem:[%s1263_s6 + $0x78] sm:$0xff] }
  0x21   : > { %325 = vmatpush.msra.mxu0 %v312_v4  ;;  %372 = vmatpush.msra.mxu1 %v350_v11  ;;  %v886_v26 = vld [vmem:[%s1259_s2] ss:$0 sm:$0xff]  ;;  %v464_v54 = vld [vmem:[%s1263_s6 + $0x70] sm:$0xff]  ;;  %v463_v56 = vld [vmem:[%s1263_s6 + $0x68] sm:$0xff] }
  0x22   : > { %v413_v47 = vld [vmem:[%s1261_s4] sm:$0xf]  ;;  %466 = vmatpush.msra.mxu3 %v465_v53  ;;  %v461_v60 = vld [vmem:[%s1263_s6 + $0x58] sm:$0xff]  ;;  %v460_v63 = vld [vmem:[%s1263_s6 + $0x50] sm:$0xff] }
  0x23   : > { %326 = vmatpush.msra.mxu0 %v311_v5  ;;  %373 = vmatpush.msra.mxu1 %v349_v13  ;;  %v447_v48 = vld [vmem:[%s1262_s5] sm:$0xf]  ;;  %v459_v1 = vld [vmem:[%s1263_s6 + $0x48] sm:$0xff]  ;;  %v457_v5 = vld [vmem:[%s1263_s6 + $0x38] sm:$0xff] }
  0x24   : > { %770 = vmatpush.msk.msra.mxu2 %vm420_vm2, %v413_v47  ;;  %467 = vmatpush.msra.mxu3 %v464_v54  ;;  %v462_v58 = vld [vmem:[%s1263_s6 + $0x60] sm:$0xff]  ;;  %v456_v6 = vld [vmem:[%s1263_s6 + $0x30] sm:$0xff]  ;;  %v455_v7 = vld [vmem:[%s1263_s6 + $0x28] sm:$0xff] }
  0x25   : > { %327 = vmatpush.msra.mxu0 %v310_v8  ;;  %374 = vmatpush.msra.mxu1 %v348_v23  ;;  %v458_v3 = vld [vmem:[%s1263_s6 + $0x40] sm:$0xff]  ;;  %v453_v9 = vld [vmem:[%s1263_s6 + $0x18] sm:$0xff]  ;;  %v451_v11 = vld [vmem:[%s1263_s6 + $0x8] sm:$0xff] }
  0x26   : > { %773 = vmatpush.msk.msrb.mxu2 %vm420_vm2, %v447_v48  ;;  %468 = vmatpush.msra.mxu3 %v463_v56  ;;  %v454_v8 = vld [vmem:[%s1263_s6 + $0x20] sm:$0xff] }
  0x27   : > { %328 = vmatpush.msra.mxu0 %v309_v10  ;;  %375 = vmatpush.msra.mxu1 %v347_v24  ;;  %v452_v10 = vld [vmem:[%s1263_s6 + $0x10] sm:$0xff] }
  0x28   : > { %469 = vmatpush.msra.mxu3 %v462_v58 }
  0x29   : > { %329 = vmatpush.msra.mxu0 %v308_v12  ;;  %376 = vmatpush.msra.mxu1 %v346_v25  ;;  %v450_v12 = vld [vmem:[%s1263_s6] sm:$0xff] }
  0x2a   : > { %470 = vmatpush.msra.mxu3 %v461_v60 }
  0x2b   : > { %330 = vmatpush.msra.mxu0 %v307_v14 }
  0x2c   : > { %471 = vmatpush.msra.mxu3 %v460_v63 }
  0x2d   : > { %331 = vmatpush.msra.mxu0 %v306_v15 }
  0x2e   : > { %472 = vmatpush.msra.mxu3 %v459_v1 }
  0x2f   : > { %332 = vmatpush.msra.mxu0 %v305_v16 }
  0x30   : > { %473 = vmatpush.msra.mxu3 %v458_v3 }
  0x31   : > { %333 = vmatpush.msra.mxu0 %v304_v17  ;;  %v515_v17 = vlaneseq }
  0x32   : > { %474 = vmatpush.msra.mxu3 %v457_v5 }
  0x33   : > { %334 = vmatpush.msra.mxu0 %v303_v18  ;;  %v516_v18 = vshrl.u32 %v515_v17, 7 }
  0x34   : > { %475 = vmatpush.msra.mxu3 %v456_v6 }
  0x35   : > { %335 = vmatpush.msra.mxu0 %v302_v19  ;;  %v518_v19 = vstv %s1052_s12  ;;  %v517_v25 = vadd.s32 8, %v516_v18 }
  0x36   : > { %476 = vmatpush.msra.mxu3 %v455_v7 }
  0x37   : > { %336 = vmatpush.msra.mxu0 %v301_v20  ;;  %v519_v20 = vadd.s32 %v518_v19, %v516_v18 }
  0x38   : > { %337 = vmatmul.f32.vlgmr.msra.gmra.mxu0 %v1127_v21  ;;  %477 = vmatpush.msra.mxu3 %v454_v8 }
  0x39   : > { %vm521_vm3 = vcmp.lt.s32.totalorder %v519_v20, 16 }
  0x3a   : > { %478 = vmatpush.msra.mxu3 %v453_v9 }
  0x3c   : > { %479 = vmatpush.msra.mxu3 %v452_v10 }
  0x3e   : > { %480 = vmatpush.msra.mxu3 %v451_v11 }
  0x40   : > { %340 = vmatmul.f32.gmra.mxu0 %v1131_v22  ;;  %481 = vmatpush.msra.mxu3 %v450_v12 }
  0xb5   : > { %v338_v27 = vpop.f32.mrf.mxu0 }
  0xb6   : > { %v339_v28 = vadd.f32 %v886_v26, %v338_v27 }
  0xb8   : > { %v344_v29 = vmax.f32 %v339_v28, 0.0 }
  0xba   : > { %768 = vmatmul.msk.f32.vlgmr.msra.gmra.mxu1 %vm354_vm0, %v344_v29 }
  0xbd   : > { %v341_v30 = vpop.f32.mrf.mxu0 }
  0xbe   : > { %v342_v31 = vadd.f32 %v886_v26, %v341_v30 }
  0xc0   : > { %v345_v32 = vmax.f32 %v342_v31, 0.0 }
  0xc2   : > { %769 = vmatmul.msk.f32.gmra.mxu1 %vm354_vm0, %v345_v32 }
 0x137   : > { %v378_v33 = vpop.f32.mrf.mxu1 }
 0x138   : > { %v385_v34 = vsel %vm384_vm1, %v378_v33, -inf }
 0x139   : > { %386 = vmax.xlane.f32.xlu0 %v385_v34 }
 0x13f   : > { %v381_v35 = vpop.f32.mrf.mxu1 }
 0x140   : > { %v388_v36 = vsel %vm384_vm1, %v381_v35, -inf }
 0x141   : > { %389 = vmax.xlane.f32.xlu0 %v388_v36 }
 0x1ac   : > { %v387_v37 = vpop.xlane.xlu0 %386 }
 0x1ad   : > { %v391_v38 = vsub.f32 %v378_v33, %v387_v37 }
 0x1af   : > { %v393_v39 = vmul.f32 1.442695, %v391_v38 }
 0x1b1   : > { %887 = vpow2.f32 %v393_v39 }
 0x1b4   : > { %v390_v40 = vpop.xlane.xlu0 %389 }
 0x1b5   : > { %v392_v41 = vsub.f32 %v381_v35, %v390_v40 }
 0x1b7   : > { %v888_v42 = vpop.eup %887  ;;  %v395_v43 = vmul.f32 1.442695, %v392_v41 }
 0x1b8   : > { %v397_v44 = vsel %vm384_vm1, %v888_v42, 0.0 }
 0x1b9   : > { %889 = vpow2.f32 %v395_v43  ;;  %398 = vadd.xlane.f32.xlu1 %v397_v44 }
 0x1bf   : > { %v890_v45 = vpop.eup %889 }
 0x1c0   : > { %v400_v46 = vsel %vm384_vm1, %v890_v45, 0.0 }
 0x1c1   : > { %401 = vadd.xlane.f32.xlu1 %v400_v46 }
 0x22c   : > { %v399_v49 = vpop.xlane.xlu1 %398 }
 0x22d   : > { %891 = vrcp.f32 %v399_v49 }
 0x233   : > { %v892_v50 = vpop.eup %891 }
 0x234   : > { %v405_v51 = vmul.f32 %v892_v50, %v399_v49  ;;  %v402_v52 = vpop.xlane.xlu1 %401 }
 0x235   : > { %893 = vrcp.f32 %v402_v52 }
 0x236   : > { %v407_v55 = vsub.f32 2.0, %v405_v51 }
 0x238   : > { %v409_v57 = vmul.f32 %v892_v50, %v407_v55 }
 0x23a   : > { %v411_v59 = vmul.f32 %v888_v42, %v409_v57 }
 0x23b   : > { %v894_v61 = vpop.eup %893 }
 0x23c   : > { %v406_v62 = vmul.f32 %v894_v61, %v402_v52  ;;  %771 = vmatmul.msk.f32.vlgmr.msra.gmra.mxu2 %vm384_vm1, %v411_v59 }
 0x23e   : > { %v408_v0 = vsub.f32 2.0, %v406_v62 }
 0x240   : > { %v410_v2 = vmul.f32 %v894_v61, %v408_v0 }
 0x242   : > { %v412_v4 = vmul.f32 %v890_v45, %v410_v2 }
 0x244   : > { %772 = vmatmul.msk.f32.gmra.mxu2 %vm384_vm1, %v412_v4 }
 0x24c   : > { %774 = vmatmul.msk.f32.vlgmr.msrb.gmra.mxu2 %vm384_vm1, %v411_v59 }
 0x254   : > { %775 = vmatmul.msk.f32.gmra.mxu2 %vm384_vm1, %v412_v4 }
 0x2bf   : > { %v441_v13 = vpop.f32.mrf.mxu2 }
 0x2c0   : > { %v448_v14 = vmul.f32 %v441_v13, %v1127_v21  ;;  %v520_v21 = vadd.s32 %v518_v19, %v517_v25 }
 0x2c2   : > { %482 = vmatmul.f32.vlgmr.msra.gmra.mxu3 %v448_v14  ;;  %vm522_vm5 = vcmp.lt.s32.totalorder %v520_v21, 16 }
 0x2c7   : > { %v444_v15 = vpop.f32.mrf.mxu2 }
 0x2c8   : > { %v449_v16 = vmul.f32 %v444_v15, %v1131_v22 }
 0x2ca   : > { %485 = vmatmul.f32.gmra.mxu3 %v449_v16 }
 0x2cf   : > { %v509_v23 = vpop.f32.mrf.mxu2 }
 0x2d7   : > { %v512_v28 = vpop.f32.mrf.mxu2 }
 0x345   : > { %v483_v24 = vpop.f32.mrf.mxu3 }
 0x346   : > { %v510_v26 = vadd.f32 %v509_v23, %v483_v24 }
 0x348   : > { %v527_v27 = vsel %vm521_vm3, %v510_v26, 0.0 }
 0x349   : > { %530 = vst.msk [vmem:[%s1060_s19] sm:$0xff] %vm529_vm4, %v527_v27 }
 0x34d   : > { %v486_v29 = vpop.f32.mrf.mxu3 }
 0x34e   : > { %v513_v30 = vadd.f32 %v512_v28, %v486_v29 }
 0x350   : > { %v528_v22 = vsel %vm522_vm5, %v513_v30, 0.0 }
 0x351   : > { %531 = vst.msk [vmem:[%s1060_s19 + $0x8] sm:$0xff] %vm529_vm4, %v528_v22 }
 0x352 PF: > { %p776_p10 = scmp.lt.s32.totalorder %s1052_s12, 16 }
 0x354   : > { %535 = sbr.rel (%p776_p10) target bundleno = 860 (0x35c), region = 56 }
 0x359   : > { %vm536_vm6 = vcmask 293888   ;;  %v983_v31 = vmov 0.0  }
 0x35a   : > { %537 = vst.msk [vmem:[%s1060_s19] sm:$0xff] %vm536_vm6, %v983_v31 }
 0x35b   : > { %538 = vst.msk [vmem:[%s1060_s19 + $0x8] sm:$0xff] %vm536_vm6, %v983_v31 }
 0x35c PF: > { %545 = sbr.rel (!%p1046_p4) target bundleno = 904 (0x388), region = 60  ;;  %s778_s10 = sshll.u32 (%p1046_p4), %s1035_s27, 1 }
 0x35d   : > { %s1223_s14 = scalar_lea.vmem (%p1046_p4), %s1264_s7, %s1052_s12   ;;  %s547_s15 = ssub.s32 (%p1046_p4), 3, %s778_s10 }
 0x35e   : > { %p548_p11 = scmp.lt.s32.totalorder (%p1046_p4), %s547_s15, 2 }
 0x361   : > { %s1272_s15 = smov (!%p548_p11, %s547_s15), 2 }
 0x362   : > { %s779_s16 = sshll.u32 %s1272_s15, 3 }
 0x363   : > { %p782_p12 = scmp.eq.s32.totalorder %s779_s16, 0 }
 0x364   : > { %s1229_s17 = sshrl.u32 (!%p782_p12), %s1272_s15, 1 }
 0x365   : > { %556 = sbr.rel (%p782_p12) target bundleno = 904 (0x388), region = 64  ;;  %p783_p13 = scmp.le.s32.totalorder (!%p782_p12), %s1229_s17, 0 }
 0x36a   : > { %715 = sbr.rel (%p783_p13) target bundleno = 887 (0x377), region = 140  ;;  %s951_s27 = smov (!%p783_p13), %s1223_s14  }
 0x36b   : > { %s955_s9 = smov (!%p783_p13), %s1060_s19   ;;  %s959_s12 = smov (!%p783_p13), 0  }
 0x36c   : > { %s963_s20 = smov (!%p783_p13), 0  }
 0x36f LB: >> { %v621_v32 = vld [vmem:[%s957_s9] sm:$0xff]  ;;  %v623_v33 = vld [vmem:[%s957_s9 + $0x8] sm:$0xff]  ;;  %s625_s21 = sadd.s32 1, %s961_s12  ;;  %s615_s20 = sadd.s32 1, %s965_s20   ;;  %s965_s20 = sphi %s963_s20, %s615_s20   ;;  %s961_s12 = sphi %s959_s12, %s960_s12   ;;  %s957_s9 = sphi %s955_s9, %s630_s9   ;;  %s953_s27 = sphi %s951_s27, %s631_s27  }
 0x370   : >> { %622 = vst [vmem:[%s953_s27] sm:$0xff] %v621_v32  ;;  %p626_p0 = scmp.ge.s32.totalorder %s625_s21, %s1229_s17  ;;  %p614_p1 = scmp.ge.s32.totalorder %s615_s20, %s1229_s17 }
 0x371   : >> { %624 = vst [vmem:[%s953_s27 + $0x8] sm:$0xff] %v623_v33 }
 0x372   : >> { %s1274_s21 = smov (%p626_p0, %s625_s21), 0  ;;  %617 = sbr.rel (!%p614_p1) target bundleno = 879 (0x36f), region = 146 }
 0x373   : >> { %s784_s22 = sshll.u32 %s1274_s21, 4  ;;  %s960_s12 = smov %s1274_s21  }
 0x374   : >> { %s630_s9 = scalar_lea.vmem %s1060_s19, %s784_s22 [#allocation2]   ;;  %s631_s27 = scalar_lea.vmem %s1223_s14, %s784_s22  }
 0x377 PF: > { %s1239_s23 = sand.u32 1, %s1272_s15   ;;  %s795_s18 = sshll.u32 %s1229_s17, 4 }
 0x378   : > { %s636_s24 = scalar_lea.vmem %s1060_s19, %s795_s18 [#allocation2]   ;;  %s638_s26 = scalar_lea.vmem %s1223_s14, %s795_s18  }
 0x379   : > { %p789_p2 = scmp.le.s32.totalorder %s1239_s23, 0 }
 0x37a   : > { %s967_s29 = smov (!%p789_p2), %s638_s26   ;;  %s971_s30 = smov (!%p789_p2), %s636_s24  }
 0x37b   : > { %729 = sbr.rel (%p789_p2) target bundleno = 904 (0x388), region = 151  ;;  %s975_s10 = smov (!%p789_p2), 0  }
 0x37c   : > { %s979_s11 = smov (!%p789_p2), 0  }
 0x380 LB: >> { %v648_v34 = vld [vmem:[%s973_s30] sm:$0xff]  ;;  %s650_s13 = sadd.s32 1, %s977_s10  ;;  %s642_s11 = sadd.s32 1, %s981_s11   ;;  %s981_s11 = sphi %s979_s11, %s642_s11   ;;  %s977_s10 = sphi %s975_s10, %s976_s10   ;;  %s973_s30 = sphi %s971_s30, %s655_s30   ;;  %s969_s29 = sphi %s967_s29, %s656_s29  }
 0x381   : >> { %649 = vst [vmem:[%s969_s29] sm:$0xff] %v648_v34  ;;  %p651_p3 = scmp.ge.s32.totalorder %s650_s13, %s1239_s23  ;;  %p641_p4 = scmp.ge.s32.totalorder %s642_s11, %s1239_s23 }
 0x383   : >> { %s1276_s13 = smov (%p651_p3, %s650_s13), 0  ;;  %644 = sbr.rel (!%p641_p4) target bundleno = 896 (0x380), region = 157 }
 0x384   : >> { %s790_s19 = sshll.u32 %s1276_s13, 3  ;;  %s976_s10 = smov %s1276_s13  }
 0x385   : >> { %s655_s30 = scalar_lea.vmem %s636_s24, %s790_s19 [#allocation2]   ;;  %s656_s29 = scalar_lea.vmem %s638_s26, %s790_s19  }
 0x388 PF: > { %p14_p5 = scmp.ge.s32.totalorder %s1037_s28, 4   ;;  %s1266_s24 = smov %s945_s25 }
 0x389   : > { %s1267_s25 = smov %s1044_s8  ;;  %s1268_s26 = smov %s1037_s28 }
 0x38a   :  { %16 = sbr.rel (!%p14_p5) target bundleno = 2 (0x2), region = 168 }

</bundles_post_ra>
